<compile_context>
chip_gen: v7x
topology: tpu7x:2x2x1
jax: 0.10.0
libtpu: 0.0.40
codegen_flags: <defaults>
</compile_context>

<pallas_src>
import math

import jax
import jax.numpy as jnp
from jax.experimental import pallas as pl
from jax.experimental.pallas import tpu as pltpu


def _round_up(x, m):
    return ((x + m - 1) // m) * m


# ---------------------------------------------------------------------------
# Kernels
# ---------------------------------------------------------------------------
def _make_affine_kernel(mm_dtype):
    """Single fused affine layer: o = x @ W + b (f32 accumulate, f32 bias add)."""

    def kernel(x_ref, w_ref, b_ref, o_ref):
        x = x_ref[...]
        if mm_dtype is not None:
            x = x.astype(mm_dtype)  # cast on the VPU; x streams from HBM in f32
        acc = jnp.dot(x, w_ref[...], preferred_element_type=jnp.float32)
        o_ref[...] = (acc + b_ref[...]).astype(o_ref.dtype)

    return kernel


def _make_chained_kernel(activation, mm_dtype):
    """Fused 3-layer MLP for a non-identity activation (eval-mode dropout)."""
    act = activation if activation is not None else (lambda h: h)

    def kernel(x_ref, w1_ref, b1_ref, w2_ref, b2_ref, w3_ref, b3_ref, o_ref):
        # TODO(synk): dropout with p >= 0 in *training* mode would need
        # pltpu.prng_seed + pltpu.stateful_bernoulli here; eval mode is identity.
        def affine(h, w_ref, b_ref):
            lhs = h if mm_dtype is None else h.astype(mm_dtype)
            return jnp.dot(lhs, w_ref[...],
                           preferred_element_type=jnp.float32) + b_ref[...]

        h = act(x_ref[...].astype(jnp.float32))
        h = affine(h, w1_ref, b1_ref)
        h = act(h)
        h = affine(h, w2_ref, b2_ref)
        h = act(h)
        h = affine(h, w3_ref, b3_ref)
        o_ref[...] = h.astype(o_ref.dtype)

    return kernel


# ---------------------------------------------------------------------------
# Spec / tiling helpers
# ---------------------------------------------------------------------------
def _const_block_spec(shape, index_map, single_buffer):
    """Spec for a block whose index_map is constant over the whole grid.

    Requests single buffering (halves the weight VMEM footprint) when this JAX
    exposes BlockSpec.pipeline_mode; otherwise falls back to the default.
    """
    if single_buffer:
        try:
            return pl.BlockSpec(shape, index_map, pipeline_mode=pl.Buffered(1))
        except (AttributeError, TypeError):
            pass
    return pl.BlockSpec(shape, index_map)


def _pick_out_pad(out_feat):
    """Lane-dense (128-multiple) output width only when padding is cheap."""
    padded = _round_up(out_feat, 128)
    if padded - out_feat <= max(out_feat // 4, 0):  # <= 25% extra columns
        return padded
    return out_feat  # small out_feat: masked vst beats a 16x padded writeback


def _pick_batch_tile(B, bytes_per_row):
    """Target ~2 MiB streamed per grid step; guarantee >=2 steps for big B."""
    bt = min(_round_up(max((2 << 20) // max(bytes_per_row, 1), 256), 256), 4096)
    bt = min(bt, _round_up(B, 8))
    if B > 512 and pl.cdiv(B, bt) < 2:  # v7x megacore: give both cores work
        bt = _round_up(pl.cdiv(B, 2), 8)
    return bt


# ---------------------------------------------------------------------------
# Wrapper
# ---------------------------------------------------------------------------
def mlp_forward(x, params, *, activation=None, dropout_p=-1, batch_tile=None,
                matmul_dtype=jnp.bfloat16, min_pallas_rows=128):
    """Forward pass of the 3-layer MLP (matches MLP.forward in npsn/model.py).

    x: [B, in_feat].  params = ((w1,b1),(w2,b2),(w3,b3)); w_i stored
    pre-transposed [fan_in, fan_out] (x @ w == torch x @ W.T), b_i [1, fan_out].
    matmul_dtype: MXU operand dtype (bf16 default); pass None for f32 operands.
    """
    (w1, b1), (w2, b2), (w3, b3) = params
    B, in_feat = x.shape
    out_feat = w3.shape[1]
    f32 = jnp.float32
    out_dtype = x.dtype
    identity = (activation is None) and (dropout_p is None or dropout_p < 0)

    # =======================================================================
    # Identity activation/dropout: collapse the three affine layers into one.
    #   W = W1 @ W2 @ W3,  b = (b1 @ W2 + b2) @ W3 + b3      (exact, in f32)
    # =======================================================================
    if identity:
        W = (w1.astype(f32) @ w2.astype(f32)) @ w3.astype(f32)
        b = ((b1.astype(f32) @ w2.astype(f32) + b2.astype(f32)) @ w3.astype(f32)
             + b3.astype(f32))

        # Tiny batches are pure launch/pipeline overhead for Pallas.
        if B < min_pallas_rows:
            return (x.astype(f32) @ W + b).astype(out_dtype)

        mm_dtype = matmul_dtype
        cast_bytes = 0 if mm_dtype is None else jnp.dtype(mm_dtype).itemsize
        if mm_dtype is not None:
            W = W.astype(mm_dtype)  # one pass over the (small) folded weight

        out_pad = _pick_out_pad(out_feat)
        if out_pad != out_feat:
            W = jnp.pad(W, ((0, 0), (0, out_pad - out_feat)))
            b = jnp.pad(b, ((0, 0), (0, out_pad - out_feat)))

        # N-tile only when the weight block gets large; tn multiple of 256
        # fills the v6e/v7x MXU, and keeps the resident block v7x-VMEM friendly.
        tn = out_pad if out_pad <= 1024 else 512
        n_steps = pl.cdiv(out_pad, tn)
        w_blk_bytes = in_feat * tn * W.dtype.itemsize + tn * 4

        def vmem_work(bt):
            return (2 * bt * in_feat * x.dtype.itemsize     # x tiles (dbl-buffered)
                    + 2 * bt * tn * out_dtype.itemsize      # out tiles (dbl-buffered)
                    + bt * in_feat * cast_bytes             # in-kernel bf16 cast temp
                    + bt * tn * 4                           # f32 matmul accumulator
                    + w_blk_bytes)                          # resident W + b block

        if batch_tile is None:
            bt = _pick_batch_tile(
                B, in_feat * x.dtype.itemsize + tn * out_dtype.itemsize)
        else:
            bt = _round_up(batch_tile, 8)
        # Stay under every generation's scoped-VMEM default (v5e ~16 MiB).
        while vmem_work(bt) > (12 << 20) and bt > 256:
            bt = _round_up(max(bt // 2, 8), 8)
        work = vmem_work(bt)

        cp_kwargs = dict(dimension_semantics=("parallel", "parallel"))
        if work > (12 << 20):  # huge weight block: raise the limit explicitly
            cp_kwargs["vmem_limit_bytes"] = work + w_blk_bytes + (2 << 20)

        grid = (pl.cdiv(B, bt), n_steps)  # ragged tail handled by masked blocks
        kernel = _make_affine_kernel(mm_dtype)

        def run(single_buffer):
            return pl.pallas_call(
                kernel,
                out_shape=jax.ShapeDtypeStruct((B, out_pad), out_dtype),
                grid=grid,
                in_specs=[
                    pl.BlockSpec((bt, in_feat), lambda i, j: (i, 0)),
                    _const_block_spec((in_feat, tn), lambda i, j: (0, j),
                                      single_buffer),
                    _const_block_spec((1, tn), lambda i, j: (0, j),
                                      single_buffer),
                ],
                out_specs=pl.BlockSpec((bt, tn), lambda i, j: (i, j)),
                compiler_params=pltpu.CompilerParams(**cp_kwargs),
            )(x, W, b)

        try:
            out = run(True)
        except Exception:  # Mosaic rejected single-buffered specs: use default
            out = run(False)
        return out if out_pad == out_feat else out[:, :out_feat]

    # =======================================================================
    # General path: non-identity activation (eval-mode dropout is identity).
    # =======================================================================
    h1, h2 = w1.shape[1], w2.shape[1]
    act = activation if activation is not None else (lambda h: h)

    if B < min_pallas_rows:
        h = x.astype(f32)
        for w_i, b_i in ((w1, b1), (w2, b2), (w3, b3)):
            h = act(h) @ w_i.astype(f32) + b_i.astype(f32)
        return h.astype(out_dtype)

    mm_dtype = matmul_dtype
    def _w(w):
        return w if mm_dtype is None else w.astype(mm_dtype)
    w1c, w2c, w3c = _w(w1), _w(w2), _w(w3)
    b1f, b2f, b3f = b1.astype(f32), b2.astype(f32), b3.astype(f32)

    out_pad = _pick_out_pad(out_feat)
    if out_pad != out_feat:
        w3c = jnp.pad(w3c, ((0, 0), (0, out_pad - out_feat)))
        b3f = jnp.pad(b3f, ((0, 0), (0, out_pad - out_feat)))

    w_bytes = (w1c.size * w1c.dtype.itemsize + w2c.size * w2c.dtype.itemsize
               + w3c.size * w3c.dtype.itemsize + (h1 + h2 + out_pad) * 4)

    def vmem_work(bt):
        return (2 * bt * in_feat * x.dtype.itemsize
                + 2 * bt * out_pad * out_dtype.itemsize
                + bt * (in_feat + h1 + h2 + out_pad) * 4   # f32 hidden temps
                + w_bytes)                                 # resident weights + biases

    if batch_tile is None:
        bt = _pick_batch_tile(
            B, in_feat * x.dtype.itemsize + out_pad * out_dtype.itemsize)
    else:
        bt = _round_up(batch_tile, 8)
    while vmem_work(bt) > (12 << 20) and bt > 256:
        bt = _round_up(max(bt // 2, 8), 8)
    work = vmem_work(bt)

    cp_kwargs = dict(dimension_semantics=("parallel",))
    if work > (12 << 20):
        cp_kwargs["vmem_limit_bytes"] = work + w_bytes + (2 << 20)

    grid = (pl.cdiv(B, bt),)
    kernel = _make_chained_kernel(activation, mm_dtype)

    def run(single_buffer):
        return pl.pallas_call(
            kernel,
            out_shape=jax.ShapeDtypeStruct((B, out_pad), out_dtype),
            grid=grid,
            in_specs=[
                pl.BlockSpec((bt, in_feat), lambda i: (i, 0)),
                _const_block_spec((in_feat, h1), lambda i: (0, 0), single_buffer),
                _const_block_spec((1, h1), lambda i: (0, 0), single_buffer),
                _const_block_spec((h1, h2), lambda i: (0, 0), single_buffer),
                _const_block_spec((1, h2), lambda i: (0, 0), single_buffer),
                _const_block_spec((h2, out_pad), lambda i: (0, 0), single_buffer),
                _const_block_spec((1, out_pad), lambda i: (0, 0), single_buffer),
            ],
            out_specs=pl.BlockSpec((bt, out_pad), lambda i: (i, 0)),
            compiler_params=pltpu.CompilerParams(**cp_kwargs),
        )(x, w1c, b1f, w2c, b2f, w3c, b3f)

    try:
        out = run(True)
    except Exception:
        out = run(False)
    return out if out_pad == out_feat else out[:, :out_feat]


# ---------------------------------------------------------------------------
# Init / reference
# ---------------------------------------------------------------------------
def init_mlp_params(key, in_feat, out_feat, hid_feat=(64, 32), dtype=jnp.float32):
    """Mirrors nn.Linear's U(-1/sqrt(fan_in), 1/sqrt(fan_in)) init.

    Weights stored pre-transposed as [fan_in, fan_out]; biases [1, fan_out].
    """
    dims = (in_feat,) + tuple(hid_feat) + (out_feat,)
    params = []
    for i in range(len(dims) - 1):
        key, kw, kb = jax.random.split(key, 3)
        fan_in, fan_out = dims[i], dims[i + 1]
        bound = 1.0 / math.sqrt(fan_in)
        w = jax.random.uniform(kw, (fan_in, fan_out), dtype, -bound, bound)
        b = jax.random.uniform(kb, (1, fan_out), dtype, -bound, bound)
        params.append((w, b))
    return tuple(params)


def mlp_reference(x, params, activation=None):
    act = activation if activation is not None else (lambda h: h)
    h = x.astype(jnp.float32)
    for w, b in params:
        h = act(h)
        h = h @ w.astype(jnp.float32) + b.astype(jnp.float32)
    return h.astype(x.dtype)


if __name__ == "__main__":
    key = jax.random.PRNGKey(0)
    k_x, k_p, k_x2, k_x3 = jax.random.split(key, 4)

    # Small shapes consistent with the module: in_feat=16, hid=(64,32), out=8.
    in_feat, out_feat, hid_feat = 16, 8, (64, 32)
    params = init_mlp_params(k_p, in_feat, out_feat, hid_feat)

    # 1) Module-default tiny batch -> small-problem XLA bypass (exact f32).
    x_small = jax.random.normal(k_x, (16, in_feat), jnp.float32)
    out_small = jax.block_until_ready(mlp_forward(x_small, params))
    ref_small = mlp_reference(x_small, params)
    assert out_small.shape == (16, out_feat), out_small.shape
    assert jnp.allclose(out_small, ref_small, atol=1e-4, rtol=1e-4), (
        float(jnp.max(jnp.abs(out_small - ref_small))))

    # 2) Same tiny batch forced through the Pallas kernel (bf16 MXU operands).
    out_small_k = jax.block_until_ready(
        mlp_forward(x_small, params, min_pallas_rows=0))
    assert out_small_k.shape == (16, out_feat), out_small_k.shape
    assert jnp.allclose(out_small_k, ref_small, atol=2e-2, rtol=2e-2), (
        float(jnp.max(jnp.abs(out_small_k - ref_small))))

    # 3) Larger batch: >=2 "parallel" grid steps through the fused affine kernel.
    x_big = jax.random.normal(k_x2, (640, in_feat), jnp.float32)
    out_big = jax.block_until_ready(mlp_forward(x_big, params))
    ref_big = mlp_reference(x_big, params)
    assert out_big.shape == (640, out_feat), out_big.shape
    assert jnp.allclose(out_big, ref_big, atol=2e-2, rtol=2e-2), (
        float(jnp.max(jnp.abs(out_big - ref_big))))

    # 4) Ragged batch: masked partial final block (no wrapper-side padding of x).
    x_rag = jax.random.normal(k_x3, (300, in_feat), jnp.float32)
    out_rag = jax.block_until_ready(mlp_forward(x_rag, params))
    ref_rag = mlp_reference(x_rag, params)
    assert out_rag.shape == (300, out_feat), out_rag.shape
    assert jnp.allclose(out_rag, ref_rag, atol=2e-2, rtol=2e-2), (
        float(jnp.max(jnp.abs(out_rag - ref_rag))))

    # 5) Non-identity activation: fused 3-layer chained kernel path.
    x_act = jax.random.normal(jax.random.PRNGKey(7), (256, in_feat), jnp.float32)
    out_act = jax.block_until_ready(
        mlp_forward(x_act, params, activation=jax.nn.relu))
    ref_act = mlp_reference(x_act, params, activation=jax.nn.relu)
    assert out_act.shape == (256, out_feat), out_act.shape
    assert jnp.allclose(out_act, ref_act, atol=5e-2, rtol=5e-2), (
        float(jnp.max(jnp.abs(out_act - ref_act))))

    print("KERNEL_OK")
</pallas_src>

<mosaic_0001>
module attributes {stable_mosaic.version = 11 : i64} {
  func.func @kernel(%arg0: i32, %arg1: i32, %arg2: memref<16x16xf32, #tpu.memory_space<vmem>>, %arg3: memref<16x8xbf16, #tpu.memory_space<vmem>>, %arg4: memref<1x8xf32, #tpu.memory_space<vmem>>, %arg5: memref<16x8xf32, #tpu.memory_space<vmem>>) attributes {dimension_semantics = [#tpu.dimension_semantics<parallel>, #tpu.dimension_semantics<parallel>], iteration_bounds = array<i64: 1, 1>, scalar_prefetch = 0 : i64, scratch_operands = 0 : i64, tpu.core_type = #tpu.core_type<tc>, window_params = [{transform_indices = @transform_0, window_bounds = array<i64: 16, 16>}, {pipeline_mode = #tpu.pipeline_mode<synchronous>, transform_indices = @transform_1, window_bounds = array<i64: 16, 8>}, {pipeline_mode = #tpu.pipeline_mode<synchronous>, transform_indices = @transform_2, window_bounds = array<i64: 1, 8>}, {transform_indices = @transform_3, window_bounds = array<i64: 16, 8>}]} {
    %c0 = arith.constant 0 : index
    %c0_0 = arith.constant 0 : index
    %0 = vector.load %arg2[%c0, %c0_0] : memref<16x16xf32, #tpu.memory_space<vmem>>, vector<16x16xf32>
    %1 = arith.truncf %0 : vector<16x16xf32> to vector<16x16xbf16>
    %c0_1 = arith.constant 0 : index
    %c0_2 = arith.constant 0 : index
    %2 = vector.load %arg3[%c0_1, %c0_2] : memref<16x8xbf16, #tpu.memory_space<vmem>>, vector<16x8xbf16>
    %cst = arith.constant dense<0.000000e+00> : vector<16x8xf32>
    %3 = tpu.matmul %1, %2, %cst {dimension_numbers = #tpu.dot_dimension_numbers<[1], [0], [0], [1], [0, 0, 1, 1], [], []>} : vector<16x16xbf16>, vector<16x8xbf16>, vector<16x8xf32> -> vector<16x8xf32>
    %c0_3 = arith.constant 0 : index
    %c0_4 = arith.constant 0 : index
    %4 = vector.load %arg4[%c0_3, %c0_4] : memref<1x8xf32, #tpu.memory_space<vmem>>, vector<1x8xf32>
    %5 = vector.broadcast %4 : vector<1x8xf32> to vector<16x8xf32>
    %6 = arith.addf %3, %5 : vector<16x8xf32>
    %c0_5 = arith.constant 0 : index
    %c0_6 = arith.constant 0 : index
    %7 = vector.load %arg5[%c0_5, %c0_6] : memref<16x8xf32, #tpu.memory_space<vmem>>, vector<16x8xf32>
    tpu.vector_store %arg5[%c0_5, %c0_6], %6 {strides = array<i32>} : memref<16x8xf32, #tpu.memory_space<vmem>>, vector<16x8xf32>,
    return
  }
  func.func @transform_0(%arg0: i32, %arg1: i32) -> (i32, i32) {
    %c0_i32 = arith.constant 0 : i32
    %c0_i32_0 = arith.constant 0 : i32
    return %arg0, %c0_i32 : i32, i32
  }
  func.func @transform_1(%arg0: i32, %arg1: i32) -> (i32, i32) {
    %c0_i32 = arith.constant 0 : i32
    %c0_i32_0 = arith.constant 0 : i32
    return %c0_i32, %arg1 : i32, i32
  }
  func.func @transform_2(%arg0: i32, %arg1: i32) -> (i32, i32) {
    %c0_i32 = arith.constant 0 : i32
    %c0_i32_0 = arith.constant 0 : i32
    return %c0_i32, %arg1 : i32, i32
  }
  func.func @transform_3(%arg0: i32, %arg1: i32) -> (i32, i32) {
    %c0_i32 = arith.constant 0 : i32
    return %arg0, %arg1 : i32, i32
  }
}

module attributes {stable_mosaic.version = 11 : i64} {
  func.func @kernel(%arg0: i32, %arg1: i32, %arg2: memref<16x16xf32, #tpu.memory_space<vmem>>, %arg3: memref<16x8xbf16, #tpu.memory_space<vmem>>, %arg4: memref<1x8xf32, #tpu.memory_space<vmem>>, %arg5: memref<16x8xf32, #tpu.memory_space<vmem>>) attributes {dimension_semantics = [#tpu.dimension_semantics<parallel>, #tpu.dimension_semantics<parallel>], iteration_bounds = array<i64: 1, 1>, scalar_prefetch = 0 : i64, scratch_operands = 0 : i64, tpu.core_type = #tpu.core_type<tc>, window_params = [{transform_indices = @transform_0, window_bounds = array<i64: 16, 16>}, {transform_indices = @transform_1, window_bounds = array<i64: 16, 8>}, {transform_indices = @transform_2, window_bounds = array<i64: 1, 8>}, {transform_indices = @transform_3, window_bounds = array<i64: 16, 8>}]} {
    %c0 = arith.constant 0 : index
    %c0_0 = arith.constant 0 : index
    %0 = vector.load %arg2[%c0, %c0_0] : memref<16x16xf32, #tpu.memory_space<vmem>>, vector<16x16xf32>
    %1 = arith.truncf %0 : vector<16x16xf32> to vector<16x16xbf16>
    %c0_1 = arith.constant 0 : index
    %c0_2 = arith.constant 0 : index
    %2 = vector.load %arg3[%c0_1, %c0_2] : memref<16x8xbf16, #tpu.memory_space<vmem>>, vector<16x8xbf16>
    %cst = arith.constant dense<0.000000e+00> : vector<16x8xf32>
    %3 = tpu.matmul %1, %2, %cst {dimension_numbers = #tpu.dot_dimension_numbers<[1], [0], [0], [1], [0, 0, 1, 1], [], []>} : vector<16x16xbf16>, vector<16x8xbf16>, vector<16x8xf32> -> vector<16x8xf32>
    %c0_3 = arith.constant 0 : index
    %c0_4 = arith.constant 0 : index
    %4 = vector.load %arg4[%c0_3, %c0_4] : memref<1x8xf32, #tpu.memory_space<vmem>>, vector<1x8xf32>
    %5 = vector.broadcast %4 : vector<1x8xf32> to vector<16x8xf32>
    %6 = arith.addf %3, %5 : vector<16x8xf32>
    %c0_5 = arith.constant 0 : index
    %c0_6 = arith.constant 0 : index
    %7 = vector.load %arg5[%c0_5, %c0_6] : memref<16x8xf32, #tpu.memory_space<vmem>>, vector<16x8xf32>
    tpu.vector_store %arg5[%c0_5, %c0_6], %6 {strides = array<i32>} : memref<16x8xf32, #tpu.memory_space<vmem>>, vector<16x8xf32>,
    return
  }
  func.func @transform_0(%arg0: i32, %arg1: i32) -> (i32, i32) {
    %c0_i32 = arith.constant 0 : i32
    %c0_i32_0 = arith.constant 0 : i32
    return %arg0, %c0_i32 : i32, i32
  }
  func.func @transform_1(%arg0: i32, %arg1: i32) -> (i32, i32) {
    %c0_i32 = arith.constant 0 : i32
    %c0_i32_0 = arith.constant 0 : i32
    return %c0_i32, %arg1 : i32, i32
  }
  func.func @transform_2(%arg0: i32, %arg1: i32) -> (i32, i32) {
    %c0_i32 = arith.constant 0 : i32
    %c0_i32_0 = arith.constant 0 : i32
    return %c0_i32, %arg1 : i32, i32
  }
  func.func @transform_3(%arg0: i32, %arg1: i32) -> (i32, i32) {
    %c0_i32 = arith.constant 0 : i32
    return %arg0, %arg1 : i32, i32
  }
}

</mosaic_0001>

<bundles_post_ra>
// kernel: tpu_custom_call.1
= control target key start
LH: loop header
LB: loop body
LE: loop exit
PB: predicated region body
PF: predicated region fallthrough
CT: control target
= control target key end

     0   :  { %8 = vsyncpa [#allocation3], 0  ;;  %s141_s12 = smov [#allocation2]   ;;  %s190_s0 = inlined_call_operand.hbm [shape: f32[16,16], index: 0, kind: input, shape index: {}]   ;;  %s191_s1 = inlined_call_operand.vmem [shape: bf16[16,8], index: 1, kind: input, shape index: {}]   ;;  %s192_s2 = inlined_call_operand.vmem [shape: f32[1,8], index: 2, kind: input, shape index: {}]   ;;  %s193_s3 = inlined_call_operand.vmem [shape: f32[16,8], index: 3, kind: output, shape index: {}]  }
   0x1   :  { %s14_s13 = sshll.u32 %s141_s12, 4  ;;  %s117_s16 = scalar_lea.hbm %s190_s0, 256  ;;  %s15_s13 = int_to_ptr.vmem [resolvable:$true] %s14_s13 }
   0x2   :  { %p118_p0 = scmp.ne.s32.totalorder %s190_s0, %s117_s16  ;;  %p121_p1 = scmp.lt.u32.totalorder %s117_s16, %s190_s0 }
   0x4   :  { %p123_p2 = pnand %p121_p1, %p118_p0 }
   0x6   :  { %126 = shalt.err (!%p123_p2)
}
   0x7   :  { %s127_s21 = scalar_lea.vmem %s15_s13, 256  ;;  %p132_p4 = scmp.lt.s32.totalorder %s15_s13, %s15_s13 }
   0x8   :  { %p128_p3 = scmp.ne.s32.totalorder %s15_s13, %s127_s21  ;;  %p133_p5 = scmp.lt.s32.totalorder %s127_s21, %s127_s21 }
   0xa   :  { %p134_p6 = por %p133_p5, %p132_p4 }
   0xc   :  { %p135_p7 = pnand %p134_p6, %p128_p3 }
   0xe   :  { %138 = shalt.err (!%p135_p7)
}
   0xf   :  { %s142_s22 = smov 128   ;;  %s143_s23 = smov 8  }
  0x10   :  { %20 = dma.hbm_to_vmem [thread:$0]  %s190_s0, 256, %s15_s13, [#allocation3], %s142_s22, %s142_s22, %s143_s23  }
  0x11   :  { %139 = dma.done.wait [#allocation3], 256  }
  0x12   :  { %140 = vsyncadd [#allocation3], 4294967040  ;;  %v144_v0 = vmov 0.0   ;;  %vm145_vm0 = vmmov 0   ;;  %v116_v1 = vld [vmem:[%s191_s1] sm:$0xff]   ;;  %v30_v3 = vld [vmem:[#allocation2 + $0x8] sm:$0xff] }
  0x13   :  { %105 = vmatprep.subr.bf16.mxu0 %v144_v0  ;;  %107 = vmatprep.mubr.msk.bf16.mxu0 %vm145_vm0, %v144_v0  ;;  %v29_v2 = vld [vmem:[#allocation2] sm:$0xff]  ;;  %vm47_vm1 = vcmask 130048   ;;  %vm92_vm2 = vcmask 64512  }
  0x14   :  { %106 = vmatpush3.bf16.msra.mxu0 %v116_v1  ;;  %v31_v4 = vpack.c.bf16 %v30_v3, %v29_v2  ;;  %v100_v5 = vld [vmem:[%s192_s2] ss:$0 sm:$0xff] }
  0x17   :  { %108 = vmatmul.mubr.msk.bf16.vlgmr.msra.gmra.mrb[0].mxu0 %vm47_vm1, %v31_v4 }
  0xea   :  { %v85_v6 = vpop.f32.mrb[0].mxu0 }
  0xeb   :  { %v86_v7 = vadd.f32 %v100_v5, %v85_v6  ;;  %v109_v8 = vpop.f32.mrb[1].mxu0 }
  0xec   :  { %v88_v9 = vpop.f32.mrb[2].mxu0 }
  0xed   :  { %93 = vst.msk [vmem:[%s193_s3] sm:$0xff] %vm92_vm2, %v86_v7  ;;  %v89_v10 = vadd.f32 %v100_v5, %v88_v9  ;;  %v110_v11 = vpop.f32.mrb[3].mxu0 }
  0xef   :  { %94 = vst.msk [vmem:[%s193_s3 + $0x8] sm:$0xff] %vm92_vm2, %v89_v10 }
  0xf0   :  { %99 = vsyncpa [#allocation3], 1 }

// kernel: tpu_custom_call.1
= control target key start
LH: loop header
LB: loop body
LE: loop exit
PB: predicated region body
PF: predicated region fallthrough
CT: control target
= control target key end

     0   :  { %8 = vsyncpa [#allocation3], 0  ;;  %s141_s12 = smov [#allocation2]   ;;  %s190_s0 = inlined_call_operand.hbm [shape: f32[16,16], index: 0, kind: input, shape index: {}]   ;;  %s191_s1 = inlined_call_operand.vmem [shape: bf16[16,8], index: 1, kind: input, shape index: {}]   ;;  %s192_s2 = inlined_call_operand.vmem [shape: f32[1,8], index: 2, kind: input, shape index: {}]   ;;  %s193_s3 = inlined_call_operand.vmem [shape: f32[16,8], index: 3, kind: output, shape index: {}]  }
   0x1   :  { %s14_s13 = sshll.u32 %s141_s12, 4  ;;  %s117_s16 = scalar_lea.hbm %s190_s0, 256  ;;  %s15_s13 = int_to_ptr.vmem [resolvable:$true] %s14_s13 }
   0x2   :  { %p118_p0 = scmp.ne.s32.totalorder %s190_s0, %s117_s16  ;;  %p121_p1 = scmp.lt.u32.totalorder %s117_s16, %s190_s0 }
   0x4   :  { %p123_p2 = pnand %p121_p1, %p118_p0 }
   0x6   :  { %126 = shalt.err (!%p123_p2)
}
   0x7   :  { %s127_s21 = scalar_lea.vmem %s15_s13, 256  ;;  %p132_p4 = scmp.lt.s32.totalorder %s15_s13, %s15_s13 }
   0x8   :  { %p128_p3 = scmp.ne.s32.totalorder %s15_s13, %s127_s21  ;;  %p133_p5 = scmp.lt.s32.totalorder %s127_s21, %s127_s21 }
   0xa   :  { %p134_p6 = por %p133_p5, %p132_p4 }
   0xc   :  { %p135_p7 = pnand %p134_p6, %p128_p3 }
   0xe   :  { %138 = shalt.err (!%p135_p7)
}
   0xf   :  { %s142_s22 = smov 128   ;;  %s143_s23 = smov 8  }
  0x10   :  { %20 = dma.hbm_to_vmem [thread:$0]  %s190_s0, 256, %s15_s13, [#allocation3], %s142_s22, %s142_s22, %s143_s23  }
  0x11   :  { %139 = dma.done.wait [#allocation3], 256  }
  0x12   :  { %140 = vsyncadd [#allocation3], 4294967040  ;;  %v144_v0 = vmov 0.0   ;;  %vm145_vm0 = vmmov 0   ;;  %v116_v1 = vld [vmem:[%s191_s1] sm:$0xff]   ;;  %v30_v3 = vld [vmem:[#allocation2 + $0x8] sm:$0xff] }
  0x13   :  { %105 = vmatprep.subr.bf16.mxu0 %v144_v0  ;;  %107 = vmatprep.mubr.msk.bf16.mxu0 %vm145_vm0, %v144_v0  ;;  %v29_v2 = vld [vmem:[#allocation2] sm:$0xff]  ;;  %vm47_vm1 = vcmask 130048   ;;  %vm92_vm2 = vcmask 64512  }
  0x14   :  { %106 = vmatpush3.bf16.msra.mxu0 %v116_v1  ;;  %v31_v4 = vpack.c.bf16 %v30_v3, %v29_v2  ;;  %v100_v5 = vld [vmem:[%s192_s2] ss:$0 sm:$0xff] }
  0x17   :  { %108 = vmatmul.mubr.msk.bf16.vlgmr.msra.gmra.mrb[0].mxu0 %vm47_vm1, %v31_v4 }
  0xea   :  { %v85_v6 = vpop.f32.mrb[0].mxu0 }
  0xeb   :  { %v86_v7 = vadd.f32 %v100_v5, %v85_v6  ;;  %v109_v8 = vpop.f32.mrb[1].mxu0 }
  0xec   :  { %v88_v9 = vpop.f32.mrb[2].mxu0 }
  0xed   :  { %93 = vst.msk [vmem:[%s193_s3] sm:$0xff] %vm92_vm2, %v86_v7  ;;  %v89_v10 = vadd.f32 %v100_v5, %v88_v9  ;;  %v110_v11 = vpop.f32.mrb[3].mxu0 }
  0xef   :  { %94 = vst.msk [vmem:[%s193_s3 + $0x8] sm:$0xff] %vm92_vm2, %v89_v10 }
  0xf0   :  { %99 = vsyncpa [#allocation3], 1 }

</bundles_post_ra>
